<compile_context>
chip_gen: v6e
topology: v6e:2x2x1
jax: 0.10.0
libtpu: 0.0.40
codegen_flags: <defaults>
</compile_context>

<pallas_src>
import functools

import jax
import jax.numpy as jnp
from jax.experimental import pallas as pl
from jax.experimental.pallas import tpu as pltpu


LANE = 128                       # TPU lane width; node axis padded to multiples of this
DEFAULT_TN = 1024                # desired output-column tile (nodes on lanes)
DEFAULT_TK = 512                 # desired reduction tile (aggregation node axis)
VMEM_LIMIT_BYTES = 48 * 1024 * 1024   # explicit cap; safe on v5e/v6e (128 MiB) and v7x (64 MiB)


def _round_up(x, m):
    return ((x + m - 1) // m) * m


def _pick_tile(total, desired, *, min_tiles=1):
    """Largest multiple of LANE that divides `total`, is <= `desired`, and (when
    possible) leaves at least `min_tiles` tiles along the axis (v7x megacore)."""
    cap = total // min_tiles
    if cap < LANE:
        cap = total
    t = min(desired, total, cap)
    t = max((t // LANE) * LANE, LANE)
    while total % t:
        t -= LANE
    return t


# --------------------------- kernel 1: layer 1 + scalar head -----------------
def _layer1_kernel(p_ref, at_ref, b1_ref, w2_ref, z_ref, acc_ref, *, tk):
    """z^T tile = w2^T ReLU(P @ A_hat + b1) for one column tile of nodes.

    p_ref : [H, Np]  bf16  resident P = (X @ W1)^T  (nodes on lanes)
    at_ref: [tk, tn] bf16  A_hat tile (A_hat symmetric => also A_hat^T)
    b1_ref: [H, 1]   f32   layer-1 bias column
    w2_ref: [H, 1]   f32   layer-2 weight column
    z_ref : [1, tn]  bf16  lane-dense z^T output tile
    acc_ref:[H, tn]  f32   scratch accumulator
    """
    k = pl.program_id(1)

    @pl.when(k == 0)
    def _():
        acc_ref[...] = jnp.zeros_like(acc_ref)

    # Slice the resident P for this reduction tile; bf16 x bf16 -> f32 on MXU.
    start = pl.multiple_of(k * tk, LANE)
    acc_ref[...] += jnp.dot(p_ref[:, pl.ds(start, tk)], at_ref[...],
                            preferred_element_type=jnp.float32)

    @pl.when(k == pl.num_programs(1) - 1)
    def _():
        # Epilogue on the resident column tile: bias + ReLU + scalar head.
        h = jnp.maximum(acc_ref[...] + b1_ref[...], 0.0)              # [H, tn]
        z = jnp.sum(h * w2_ref[...], axis=0, keepdims=True)           # [1, tn]
        z_ref[...] = z.astype(z_ref.dtype)


def gcn_layer1_z(p_t, a_t, b1_col, w2_col, *,
                 tn_desired=DEFAULT_TN, tk_desired=DEFAULT_TK):
    h, n = p_t.shape
    assert a_t.shape == (n, n)
    tn = _pick_tile(n, tn_desired, min_tiles=2)   # keep grid[0] >= 2 when possible
    tk = _pick_tile(n, tk_desired)
    grid = (n // tn, n // tk)
    flops = 2 * n * n * h + 4 * n * h
    bytes_accessed = a_t.size * 2 + p_t.size * 2 + 2 * h * 4 + n * 2
    kernel = functools.partial(_layer1_kernel, tk=tk)
    return pl.pallas_call(
        kernel,
        out_shape=jax.ShapeDtypeStruct((1, n), jnp.bfloat16),
        grid_spec=pltpu.PrefetchScalarGridSpec(
            num_scalar_prefetch=0,
            grid=grid,
            in_specs=[
                pl.BlockSpec((h, n), lambda j, k: (0, 0)),     # P, resident (DMA once)
                pl.BlockSpec((tk, tn), lambda j, k: (k, j)),   # A_hat tile (streamed)
                pl.BlockSpec((h, 1), lambda j, k: (0, 0)),     # b1 column
                pl.BlockSpec((h, 1), lambda j, k: (0, 0)),     # w2 column
            ],
            out_specs=pl.BlockSpec((1, tn), lambda j, k: (0, j)),
            scratch_shapes=[pltpu.VMEM((h, tn), jnp.float32)],
        ),
        compiler_params=pltpu.CompilerParams(
            dimension_semantics=("parallel", "arbitrary"),
            vmem_limit_bytes=VMEM_LIMIT_BYTES),
        cost_estimate=pl.CostEstimate(flops=flops, transcendentals=0,
                                      bytes_accessed=bytes_accessed),
    )(p_t, a_t, b1_col, w2_col)


# --------------------------- kernel 2: aggregation of z ----------------------
def _aggregate_kernel(z_ref, at_ref, b2_ref, o_ref):
    """out^T tile = z^T @ A_hat + b2 (MXU dot, accumulate into resident output).

    z_ref : [1, tk]  bf16  lane-dense slice of z^T
    at_ref: [tk, tn] bf16  A_hat tile
    b2_ref: [1, 1]   f32   SMEM scalar bias
    o_ref : [1, tn]  f32   lane-dense logits row tile (resident across k)
    """
    k = pl.program_id(1)

    @pl.when(k == 0)
    def _():
        o_ref[...] = jnp.full(o_ref.shape, b2_ref[0, 0], o_ref.dtype)

    o_ref[...] += jnp.dot(z_ref[...], at_ref[...],
                          preferred_element_type=jnp.float32)


def gcn_aggregate(z_row, a_t, b2, *, tn_desired=DEFAULT_TN, tk_desired=DEFAULT_TK):
    n = a_t.shape[0]
    tn = _pick_tile(n, tn_desired, min_tiles=2)
    tk = _pick_tile(n, tk_desired)
    grid = (n // tn, n // tk)
    return pl.pallas_call(
        _aggregate_kernel,
        out_shape=jax.ShapeDtypeStruct((1, n), jnp.float32),
        grid_spec=pltpu.PrefetchScalarGridSpec(
            num_scalar_prefetch=0,
            grid=grid,
            in_specs=[
                pl.BlockSpec((1, tk), lambda j, k: (0, k)),         # z^T slice
                pl.BlockSpec((tk, tn), lambda j, k: (k, j)),        # A_hat tile
                pl.BlockSpec(memory_space=pltpu.MemorySpace.SMEM),  # b2 scalar
            ],
            out_specs=pl.BlockSpec((1, tn), lambda j, k: (0, j)),
        ),
        compiler_params=pltpu.CompilerParams(
            dimension_semantics=("parallel", "arbitrary"),
            vmem_limit_bytes=VMEM_LIMIT_BYTES),
        cost_estimate=pl.CostEstimate(flops=2 * n * n, transcendentals=0,
                                      bytes_accessed=a_t.size * 2 + n * 2 + n * 4),
    )(z_row, a_t, b2)


# ------------------------------- glue (JAX) ----------------------------------
def build_normalized_adjacency(edge_index, num_nodes):
    """A_hat = D^{-1/2}(A + I)D^{-1/2}, dense & symmetric, from a [2, E] edge list."""
    src, dst = edge_index[0], edge_index[1]
    adj = jnp.zeros((num_nodes, num_nodes), jnp.float32).at[src, dst].add(1.0)
    adj = jnp.minimum(adj + adj.T, 1.0)              # symmetrize, dedup multi-edges
    diag = jnp.arange(num_nodes)
    adj = adj.at[diag, diag].set(1.0)                # self loops: A[i,i] = 1 exactly
    deg = adj.sum(axis=1)                            # deg >= 1 (self loop) -> rsqrt safe
    d_inv_sqrt = jax.lax.rsqrt(deg)
    return adj * d_inv_sqrt[:, None] * d_inv_sqrt[None, :]


class GNNWrapperPallas:
    """JAX/Pallas port of GNNWrapper with a concrete 2-layer GCN conv_model."""

    def __init__(self, in_dim, hidden_dim, key):
        k1, k2 = jax.random.split(key)
        s1 = (6.0 / (in_dim + hidden_dim)) ** 0.5
        s2 = (6.0 / (hidden_dim + 1)) ** 0.5
        self.w1 = jax.random.uniform(k1, (in_dim, hidden_dim), jnp.float32, -s1, s1)
        self.b1 = jnp.zeros((hidden_dim,), jnp.float32)
        self.w2 = jax.random.uniform(k2, (hidden_dim, 1), jnp.float32, -s2, s2)
        self.b2 = jnp.zeros((1, 1), jnp.float32)
        # kernel-layout (node-on-lanes) parameter views
        self.b1_col = self.b1.reshape(hidden_dim, 1)     # [H, 1] f32
        self.w2_col = self.w2                            # [H, 1] f32

    def forward(self, x, edge_index):
        n = x.shape[0]
        a_hat = build_normalized_adjacency(edge_index, n)     # [N, N] f32, symmetric

        n_pad = _round_up(n, LANE)
        pad = n_pad - n
        # A_hat symmetric => no transpose; pad + bf16 cast in a single pass.
        a_bf = jnp.pad(a_hat, ((0, pad), (0, pad))).astype(jnp.bfloat16)     # [Np, Np]
        # P = (X @ W1)^T computed once in f32, shipped bf16, kept resident in kernel 1.
        p_t = jnp.pad(jnp.dot(x, self.w1).T, ((0, 0), (0, pad))).astype(jnp.bfloat16)

        # Padded columns of z are exact zeros (b1 == 0); even if b1 != 0 the final
        # logits stay correct because padded rows of A_hat are zero in kernel 2.
        z_row = gcn_layer1_z(p_t, a_bf, self.b1_col, self.w2_col)   # [1, Np] bf16
        out_row = gcn_aggregate(z_row, a_bf, self.b2)               # [1, Np] f32
        return out_row[0, :n].reshape(n, 1)                         # [N, 1] logits

    def predict(self, x, edge_index, labels):
        outputs = self.forward(x, edge_index)
        mask = labels != -100
        scores = outputs.flatten()
        is_depressed = jnp.where((scores >= 0) & mask, 1, 0)
        return labels, is_depressed

    def compute_loss(self, x, edge_index, labels):
        scores = self.forward(x, edge_index).flatten()
        mask = labels != -100
        y = jnp.where(mask, labels.astype(jnp.float32), 0.0)
        per = jnp.maximum(scores, 0.0) - scores * y + jnp.log1p(jnp.exp(-jnp.abs(scores)))
        loss = jnp.sum(jnp.where(mask, per, 0.0)) / jnp.maximum(jnp.sum(mask), 1)
        return scores, loss


# ------------------------------ reference ------------------------------------
def gcn_reference(a_hat, x, w1, b1, w2, b2):
    """f32 (HIGHEST) reference mirroring the kernels' wire dtypes (bf16 A/P/z)."""
    dot = functools.partial(jnp.dot, precision=jax.lax.Precision.HIGHEST)
    q = lambda t: t.astype(jnp.bfloat16).astype(jnp.float32)
    a_q = q(a_hat)
    p_q = q(dot(x, w1))
    h = jnp.maximum(dot(a_q, p_q) + b1, 0.0)
    z_q = q(dot(h, w2))
    return dot(a_q, z_q) + b2.reshape(1, 1)


if __name__ == "__main__":
    key = jax.random.PRNGKey(0)
    k_feat, k_edge, k_param = jax.random.split(key, 3)

    # small, lane-aligned graph: 256 nodes, 128-d features, 128 hidden, 1024 edges
    N, F, H, E = 256, 128, 128, 1024
    x = jax.random.normal(k_feat, (N, F), dtype=jnp.float32)
    edge_index = jax.random.randint(k_edge, (2, E), 0, N, dtype=jnp.int32)

    model = GNNWrapperPallas(F, H, k_param)
    out = jax.block_until_ready(model.forward(x, edge_index))

    a_hat = build_normalized_adjacency(edge_index, N)
    ref = gcn_reference(a_hat, x, model.w1, model.b1, model.w2, model.b2)

    assert out.shape == (N, 1)
    max_err = float(jnp.max(jnp.abs(out - ref)))
    assert jnp.allclose(out, ref, atol=3e-2, rtol=3e-2), f"mismatch vs reference: {max_err}"

    print("KERNEL_OK")
</pallas_src>

<mosaic_0001>
module attributes {stable_mosaic.version = 11 : i64} {
  func.func @_layer1_kernel(%arg0: i32, %arg1: i32, %arg2: memref<128x256xbf16, #tpu.memory_space<vmem>>, %arg3: memref<256x128xbf16, #tpu.memory_space<vmem>>, %arg4: memref<128x1xf32, #tpu.memory_space<vmem>>, %arg5: memref<128x1xf32, #tpu.memory_space<vmem>>, %arg6: memref<1x128xbf16, #tpu.memory_space<vmem>>, %arg7: memref<128x128xf32, #tpu.memory_space<vmem>>) attributes {dimension_semantics = [#tpu.dimension_semantics<parallel>, #tpu.dimension_semantics<arbitrary>], iteration_bounds = array<i64: 2, 1>, scalar_prefetch = 0 : i64, scratch_operands = 1 : i64, tpu.core_type = #tpu.core_type<tc>, window_params = [{pipeline_mode = #tpu.pipeline_mode<synchronous>, transform_indices = @transform_0, window_bounds = array<i64: 128, 256>}, {transform_indices = @transform_1, window_bounds = array<i64: 256, 128>}, {pipeline_mode = #tpu.pipeline_mode<synchronous>, transform_indices = @transform_2, window_bounds = array<i64: 128, 1>}, {pipeline_mode = #tpu.pipeline_mode<synchronous>, transform_indices = @transform_3, window_bounds = array<i64: 128, 1>}, {transform_indices = @transform_4, window_bounds = array<i64: 1, 128>}]} {
    %c0_i32 = arith.constant 0 : i32
    %0 = arith.cmpi eq, %arg1, %c0_i32 : i32
    %1 = arith.extui %0 : i1 to i32
    %c0_i32_0 = arith.constant 0 : i32
    %2 = arith.cmpi ne, %1, %c0_i32_0 : i32
    scf.if %2 {
      %cst_9 = arith.constant 0.000000e+00 : f32
      %15 = vector.broadcast %cst_9 : f32 to vector<128x128xf32>
      %c0_10 = arith.constant 0 : index
      %c0_11 = arith.constant 0 : index
      %16 = vector.load %arg7[%c0_10, %c0_11] : memref<128x128xf32, #tpu.memory_space<vmem>>, vector<128x128xf32>
      tpu.vector_store %arg7[%c0_10, %c0_11], %15 {strides = array<i32>} : memref<128x128xf32, #tpu.memory_space<vmem>>, vector<128x128xf32>,
    } else {
    }
    %c256_i32 = arith.constant 256 : i32
    %3 = arith.muli %arg1, %c256_i32 : i32
    %4 = tpu.assume_multiple %3, 128 : i32
    %c0 = arith.constant 0 : index
    %c0_1 = arith.constant 0 : index
    %5 = vector.load %arg7[%c0, %c0_1] : memref<128x128xf32, #tpu.memory_space<vmem>>, vector<128x128xf32>
    %c0_2 = arith.constant 0 : index
    %6 = arith.index_cast %4 : i32 to index
    %7 = vector.load %arg2[%c0_2, %6] : memref<128x256xbf16, #tpu.memory_space<vmem>>, vector<128x256xbf16>
    %c0_3 = arith.constant 0 : index
    %c0_4 = arith.constant 0 : index
    %8 = vector.load %arg3[%c0_3, %c0_4] : memref<256x128xbf16, #tpu.memory_space<vmem>>, vector<256x128xbf16>
    %cst = arith.constant dense<0.000000e+00> : vector<128x128xf32>
    %9 = tpu.matmul %7, %8, %cst {dimension_numbers = #tpu.dot_dimension_numbers<[1], [0], [0], [1], [0, 0, 1, 1], [], []>} : vector<128x256xbf16>, vector<256x128xbf16>, vector<128x128xf32> -> vector<128x128xf32>
    %10 = arith.addf %5, %9 : vector<128x128xf32>
    %c0_5 = arith.constant 0 : index
    %c0_6 = arith.constant 0 : index
    %11 = vector.load %arg7[%c0_5, %c0_6] : memref<128x128xf32, #tpu.memory_space<vmem>>, vector<128x128xf32>
    tpu.vector_store %arg7[%c0_5, %c0_6], %10 {strides = array<i32>} : memref<128x128xf32, #tpu.memory_space<vmem>>, vector<128x128xf32>,
    %c0_i32_7 = arith.constant 0 : i32
    %12 = arith.cmpi eq, %arg1, %c0_i32_7 : i32
    %13 = arith.extui %12 : i1 to i32
    %c0_i32_8 = arith.constant 0 : i32
    %14 = arith.cmpi ne, %13, %c0_i32_8 : i32
    scf.if %14 {
      %c0_9 = arith.constant 0 : index
      %c0_10 = arith.constant 0 : index
      %15 = vector.load %arg7[%c0_9, %c0_10] : memref<128x128xf32, #tpu.memory_space<vmem>>, vector<128x128xf32>
      %c0_11 = arith.constant 0 : index
      %c0_12 = arith.constant 0 : index
      %16 = vector.load %arg4[%c0_11, %c0_12] : memref<128x1xf32, #tpu.memory_space<vmem>>, vector<128x1xf32>
      %17 = vector.broadcast %16 : vector<128x1xf32> to vector<128x128xf32>
      %18 = arith.addf %15, %17 : vector<128x128xf32>
      %cst_13 = arith.constant 0.000000e+00 : f32
      %19 = vector.broadcast %cst_13 : f32 to vector<128x128xf32>
      %20 = arith.maximumf %18, %19 : vector<128x128xf32>
      %c0_14 = arith.constant 0 : index
      %c0_15 = arith.constant 0 : index
      %21 = vector.load %arg5[%c0_14, %c0_15] : memref<128x1xf32, #tpu.memory_space<vmem>>, vector<128x1xf32>
      %22 = vector.broadcast %21 : vector<128x1xf32> to vector<128x128xf32>
      %23 = arith.mulf %20, %22 : vector<128x128xf32>
      %cst_16 = arith.constant dense<0.000000e+00> : vector<128xf32>
      %24 = vector.multi_reduction <add>, %23, %cst_16 [0] : vector<128x128xf32> to vector<128xf32>
      %25 = vector.shape_cast %24 : vector<128xf32> to vector<1x128xf32>
      %26 = arith.truncf %25 : vector<1x128xf32> to vector<1x128xbf16>
      %c0_17 = arith.constant 0 : index
      %c0_18 = arith.constant 0 : index
      %27 = vector.load %arg6[%c0_17, %c0_18] : memref<1x128xbf16, #tpu.memory_space<vmem>>, vector<1x128xbf16>
      tpu.vector_store %arg6[%c0_17, %c0_18], %26 {strides = array<i32>} : memref<1x128xbf16, #tpu.memory_space<vmem>>, vector<1x128xbf16>,
    } else {
    }
    return
  }
  func.func @transform_0(%arg0: i32, %arg1: i32) -> (i32, i32) {
    %c0_i32 = arith.constant 0 : i32
    %c0_i32_0 = arith.constant 0 : i32
    %c0_i32_1 = arith.constant 0 : i32
    return %c0_i32, %c0_i32_0 : i32, i32
  }
  func.func @transform_1(%arg0: i32, %arg1: i32) -> (i32, i32) {
    %c0_i32 = arith.constant 0 : i32
    return %arg1, %arg0 : i32, i32
  }
  func.func @transform_2(%arg0: i32, %arg1: i32) -> (i32, i32) {
    %c0_i32 = arith.constant 0 : i32
    %c0_i32_0 = arith.constant 0 : i32
    %c0_i32_1 = arith.constant 0 : i32
    return %c0_i32, %c0_i32_0 : i32, i32
  }
  func.func @transform_3(%arg0: i32, %arg1: i32) -> (i32, i32) {
    %c0_i32 = arith.constant 0 : i32
    %c0_i32_0 = arith.constant 0 : i32
    %c0_i32_1 = arith.constant 0 : i32
    return %c0_i32, %c0_i32_0 : i32, i32
  }
  func.func @transform_4(%arg0: i32, %arg1: i32) -> (i32, i32) {
    %c0_i32 = arith.constant 0 : i32
    %c0_i32_0 = arith.constant 0 : i32
    return %c0_i32, %arg0 : i32, i32
  }
}

</mosaic_0001>

<bundles_post_ra>
// kernel: tpu_custom_call.1
= control target key start
LH: loop header
LB: loop body
LE: loop exit
PB: predicated region body
PF: predicated region fallthrough
CT: control target
= control target key end

     0   :  { %9 = vsyncpa [#allocation4], 0  ;;  %s1906_s0 = inlined_call_operand.hbm [shape: bf16[128,256], index: 0, kind: input, shape index: {}]   ;;  %s1907_s1 = inlined_call_operand.vmem [shape: bf16[256,256], index: 1, kind: input, shape index: {}]   ;;  %s1908_s2 = inlined_call_operand.vmem [shape: f32[128,1], index: 2, kind: input, shape index: {}]   ;;  %s1909_s3 = inlined_call_operand.vmem [shape: f32[128,1], index: 3, kind: input, shape index: {}]   ;;  %s1910_s4 = inlined_call_operand.hbm [shape: bf16[1,256], index: 4, kind: output, shape index: {}]  }
   0x1   :  { %10 = vsyncpa [#allocation5], 0 }
   0x2   :  { %12 = vsyncpa [#allocation5 + $0x1], 0  ;;  %s1549_s15 = smov 0   ;;  %s1551_s16 = smov 0  }
   0x3   :  { %s1553_s17 = smov 0   ;;  %s1555_s18 = smov 0  }
   0x4   :  { %s1557_s19 = smov 0   ;;  %s1559_s20 = smov 0  }
   0x5 LB: > { %s1175_s21 = sadd.s32 4294967295, %s1517_s20   ;;  %s1176_s22 = sadd.s32 4294967294, %s1517_s20   ;;  %s1517_s20 = sphi %s1559_s20, %s18_s20   ;;  %s1513_s19 = sphi %s1557_s19, %s1923_s19   ;;  %s1509_s18 = sphi %s1555_s18, %s1922_s18   ;;  %s1505_s17 = sphi %s1553_s17, %s1921_s17   ;;  %s1501_s16 = sphi %s1551_s16, %s1920_s16   ;;  %s1497_s15 = sphi %s1549_s15, %s1919_s15  }
   0x6   : > { %s30_s23 = sadd.s32 1, %s1513_s19  ;;  %s60_s24 = sadd.s32 1, %s1505_s17 }
   0x7   : > { %p32_p0 = scmp.ge.s32.totalorder %s30_s23, 2  ;;  %p67_p1 = scmp.ne.s32.totalorder %s1505_s17, %s1501_s16 }
   0x8   : > { %p68_p2 = scmp.eq.s32.totalorder %s1517_s20, 0  ;;  %p139_p3 = scmp.eq.s32.totalorder %s1175_s21, 1 }
   0x9   : > { %s1925_s23 = smov (%p32_p0, %s30_s23), 0  ;;  %p144_p6 = scmp.ne.s32.totalorder %s1501_s16, %s1497_s15 }
   0xa   : > { %p1588_p4 = por %p68_p2, %p67_p1  ;;  %p1592_p5 = por %p139_p3, %p67_p1 }
   0xb   : > { %s56_s27 = ssub.s32 %s1513_s19, %s1925_s23  ;;  %p145_p8 = scmp.eq.s32.totalorder %s1176_s22, 1 }
   0xc   : > { %s1913_s26 = scalar_select %p1592_p5, 1, 0 }
   0xd   : > { %p58_p7 = scmp.eq.s32.totalorder %s56_s27, 0  ;;  %p1177_p9 = scmp.ge.s32.totalorder %s1517_s20, 1 }
   0xe   : > { %p152_p10 = scmp.lt.s32.totalorder %s1517_s20, 3  ;;  %p1605_p11 = por %p145_p8, %p144_p6 }
   0xf   : > { %s1603_s28 = scalar_select %p58_p7, %s1505_s17, %s60_s24  }
  0x10   : > { %s1914_s29 = scalar_select %p1605_p11, 1, 0 }
  0x11   : > { %p1609_p12 = pnand %p1177_p9, %p152_p10  ;;  %p1613_p13 = scmp.eq.s32.totalorder %s1175_s21, 0 }
  0x12   : > { %s1519_s6 = smov [#allocation3]  }
  0x13   : > { %p1306_p0 = pneg %p1609_p12  ;;  %s164_s7 = sshll.u32 %s1519_s6, 4  ;;  %s165_s7 = int_to_ptr.vmem [resolvable:$true] %s164_s7 }
  0x14   : > { %s1422_s8 = scalar_lea.vmem %s165_s7, 2048  ;;  %p1430_p8 = scmp.lt.s32.totalorder %s165_s7, %s165_s7 }
  0x15   : > { %p1307_p1 = pnand %p1613_p13, %p1306_p0  ;;  %p1423_p3 = scmp.ne.s32.totalorder %s165_s7, %s1422_s8 }
  0x16   : > { %p1431_p9 = scmp.lt.s32.totalorder %s1422_s8, %s1422_s8 }
  0x17   : > { %p1413_p2 = pneg %p1307_p1 }
  0x18   : > { %p1432_p10 = por %p1431_p9, %p1430_p8 }
  0x19   : > { %p1425_p6 = pnand %p1423_p3, %p1413_p2 }
  0x1b   : > { %p1426_p7 = pneg %p1425_p6 }
  0x1d   : > { %p1433_p11 = pnand %p1432_p10, %p1426_p7 }
  0x1f   : > { %1436 = shalt.err (!%p1433_p11)
}
  0x20   : > { %s1520_s9 = smov 128   ;;  %s1521_s10 = smov 8  }
  0x21   : > { %1309 = dma.hbm_to_vmem [thread:$0]  (!%p1307_p1), %s1906_s0, 2048, %s165_s7, [#allocation4], %s1520_s9, %s1520_s9, %s1521_s10  }
  0x22   : > { %p1179_p5 = scmp.ge.s32.totalorder %s1517_s20, 2 }
  0x24   : > { %180 = sbr.rel (%p1179_p5) target bundleno = 66 (0x42), region = 28 }
  0x29   : > { %183 = sbr.rel (!%p1588_p4) target bundleno = 66 (0x42), region = 32  ;;  %s185_s13 = sand.u32 (%p1588_p4), 1, %s1505_s17  }
  0x2a   : > { %s1181_s14 = sshll.u32 (%p1588_p4), %s1513_s19, 2  ;;  %s1180_s21 = sshll.u32 (%p1588_p4), %s185_s13, 7 }
  0x2b   : > { %s1634_s27 = scalar_lea.vmem (%p1588_p4), %s1907_s1, %s1181_s14  ;;  %s1638_s25 = scalar_lea.vmem (%p1588_p4), [#allocation6], %s1180_s21 }
  0x2c   : > { %v209_v0 = vld [vmem:[%s1634_s27] sm:$0xf] (%p1588_p4)  ;;  %v211_v1 = vld [vmem:[%s1634_s27 + $0x8] sm:$0xf] (%p1588_p4)  ;;  %v213_v2 = vld [vmem:[%s1634_s27 + $0x10] sm:$0xf] (%p1588_p4) }
  0x2d   : > { %210 = vst [vmem:[%s1638_s25] sm:$0xf] (%p1588_p4), %v209_v0  ;;  %212 = vst [vmem:[%s1638_s25 + $0x4] sm:$0xf] (%p1588_p4), %v211_v1  ;;  %v215_v3 = vld [vmem:[%s1634_s27 + $0x18] sm:$0xf] (%p1588_p4) }
  0x2e   : > { %v217_v4 = vld [vmem:[%s1634_s27 + $0x20] sm:$0xf]  ;;  %214 = vst [vmem:[%s1638_s25 + $0x8] sm:$0xf] %v213_v2  ;;  %216 = vst [vmem:[%s1638_s25 + $0xc] sm:$0xf] %v215_v3 }
  0x2f   : > { %218 = vst [vmem:[%s1638_s25 + $0x10] sm:$0xf] %v217_v4  ;;  %v219_v5 = vld [vmem:[%s1634_s27 + $0x28] sm:$0xf]  ;;  %v221_v6 = vld [vmem:[%s1634_s27 + $0x30] sm:$0xf] }
  0x30   : > { %v223_v7 = vld [vmem:[%s1634_s27 + $0x38] sm:$0xf]  ;;  %220 = vst [vmem:[%s1638_s25 + $0x14] sm:$0xf] %v219_v5  ;;  %222 = vst [vmem:[%s1638_s25 + $0x18] sm:$0xf] %v221_v6 }
  0x31   : > { %224 = vst [vmem:[%s1638_s25 + $0x1c] sm:$0xf] %v223_v7  ;;  %v225_v8 = vld [vmem:[%s1634_s27 + $0x40] sm:$0xf]  ;;  %v227_v9 = vld [vmem:[%s1634_s27 + $0x48] sm:$0xf] }
  0x32   : > { %v229_v10 = vld [vmem:[%s1634_s27 + $0x50] sm:$0xf]  ;;  %226 = vst [vmem:[%s1638_s25 + $0x20] sm:$0xf] %v225_v8  ;;  %228 = vst [vmem:[%s1638_s25 + $0x24] sm:$0xf] %v227_v9 }
  0x33   : > { %230 = vst [vmem:[%s1638_s25 + $0x28] sm:$0xf] %v229_v10  ;;  %v231_v11 = vld [vmem:[%s1634_s27 + $0x58] sm:$0xf]  ;;  %v233_v12 = vld [vmem:[%s1634_s27 + $0x60] sm:$0xf] }
  0x34   : > { %v235_v13 = vld [vmem:[%s1634_s27 + $0x68] sm:$0xf]  ;;  %232 = vst [vmem:[%s1638_s25 + $0x2c] sm:$0xf] %v231_v11  ;;  %234 = vst [vmem:[%s1638_s25 + $0x30] sm:$0xf] %v233_v12 }
  0x35   : > { %236 = vst [vmem:[%s1638_s25 + $0x34] sm:$0xf] %v235_v13  ;;  %v237_v14 = vld [vmem:[%s1634_s27 + $0x70] sm:$0xf]  ;;  %v239_v15 = vld [vmem:[%s1634_s27 + $0x78] sm:$0xf] }
  0x36   : > { %v241_v16 = vld [vmem:[%s1634_s27 + $0x80] sm:$0xf]  ;;  %238 = vst [vmem:[%s1638_s25 + $0x38] sm:$0xf] %v237_v14  ;;  %240 = vst [vmem:[%s1638_s25 + $0x3c] sm:$0xf] %v239_v15 }
  0x37   : > { %242 = vst [vmem:[%s1638_s25 + $0x40] sm:$0xf] %v241_v16  ;;  %v243_v17 = vld [vmem:[%s1634_s27 + $0x88] sm:$0xf]  ;;  %v245_v18 = vld [vmem:[%s1634_s27 + $0x90] sm:$0xf] }
  0x38   : > { %v247_v19 = vld [vmem:[%s1634_s27 + $0x98] sm:$0xf]  ;;  %244 = vst [vmem:[%s1638_s25 + $0x44] sm:$0xf] %v243_v17  ;;  %246 = vst [vmem:[%s1638_s25 + $0x48] sm:$0xf] %v245_v18 }
  0x39   : > { %248 = vst [vmem:[%s1638_s25 + $0x4c] sm:$0xf] %v247_v19  ;;  %v249_v20 = vld [vmem:[%s1634_s27 + $0xa0] sm:$0xf]  ;;  %v251_v21 = vld [vmem:[%s1634_s27 + $0xa8] sm:$0xf] }
  0x3a   : > { %v253_v22 = vld [vmem:[%s1634_s27 + $0xb0] sm:$0xf]  ;;  %250 = vst [vmem:[%s1638_s25 + $0x50] sm:$0xf] %v249_v20  ;;  %252 = vst [vmem:[%s1638_s25 + $0x54] sm:$0xf] %v251_v21 }
  0x3b   : > { %254 = vst [vmem:[%s1638_s25 + $0x58] sm:$0xf] %v253_v22  ;;  %v255_v23 = vld [vmem:[%s1634_s27 + $0xb8] sm:$0xf]  ;;  %v257_v24 = vld [vmem:[%s1634_s27 + $0xc0] sm:$0xf] }
  0x3c   : > { %v259_v25 = vld [vmem:[%s1634_s27 + $0xc8] sm:$0xf]  ;;  %256 = vst [vmem:[%s1638_s25 + $0x5c] sm:$0xf] %v255_v23  ;;  %258 = vst [vmem:[%s1638_s25 + $0x60] sm:$0xf] %v257_v24 }
  0x3d   : > { %260 = vst [vmem:[%s1638_s25 + $0x64] sm:$0xf] %v259_v25  ;;  %v261_v26 = vld [vmem:[%s1634_s27 + $0xd0] sm:$0xf]  ;;  %v263_v27 = vld [vmem:[%s1634_s27 + $0xd8] sm:$0xf] }
  0x3e   : > { %v265_v28 = vld [vmem:[%s1634_s27 + $0xe0] sm:$0xf]  ;;  %262 = vst [vmem:[%s1638_s25 + $0x68] sm:$0xf] %v261_v26  ;;  %264 = vst [vmem:[%s1638_s25 + $0x6c] sm:$0xf] %v263_v27 }
  0x3f   : > { %266 = vst [vmem:[%s1638_s25 + $0x70] sm:$0xf] %v265_v28  ;;  %v267_v29 = vld [vmem:[%s1634_s27 + $0xe8] sm:$0xf]  ;;  %v269_v30 = vld [vmem:[%s1634_s27 + $0xf0] sm:$0xf] }
  0x40   : > { %v271_v31 = vld [vmem:[%s1634_s27 + $0xf8] sm:$0xf]  ;;  %268 = vst [vmem:[%s1638_s25 + $0x74] sm:$0xf] %v267_v29  ;;  %270 = vst [vmem:[%s1638_s25 + $0x78] sm:$0xf] %v269_v30 }
  0x41   : > { %272 = vst [vmem:[%s1638_s25 + $0x7c] sm:$0xf] %v271_v31 }
  0x42 PF: > { %363 = sbr.rel (%p1609_p12) target bundleno = 385 (0x181), region = 73 }
  0x47   : > { %1488 = dma.done.wait (%p1613_p13), [#allocation4], 2048  }
  0x48   : > { %1490 = vsyncadd (%p1613_p13), [#allocation4], 4294965248  ;;  %s1709_s6 = sand.u32 1, %s1501_s16   ;;  %v1522_v32 = vmov 0   ;;  %v809_v44 = vld [vmem:[%s1908_s2] sm:$0xff]  ;;  %v811_v48 = vld [vmem:[%s1908_s2 + $0x10] sm:$0xff] }
  0x49   : > { %s1184_s7 = sshll.u32 %s1709_s6, 7  ;;  %1369 = vset.pattern.permute.xlu0 %v1522_v32  ;;  %1370 = vset.pattern.permute.xlu1 %v1522_v32  ;;  %v1389_v45 = vld [vmem:[#allocation3 + $0x4] ss:$8 sps:$4 sm:$0xff]   ;;  %v812_v52 = vld [vmem:[%s1908_s2 + $0x18] sm:$0xff]  ;;  %v1387_v58 = vld [vmem:[#allocation3] ss:$8 sps:$4 sm:$0xff]  }
  0x4a   : > { %s1712_s8 = scalar_lea.vmem [#allocation6], %s1184_s7  ;;  %827 = vperm.xlu0 %1369, %v809_v44   ;;  %v1392_v46 = vld [vmem:[#allocation3 + $0x44] ss:$8 sps:$4 sm:$0xff]   ;;  %693 = vmatprep.mubr.bf16.mxu0 %v1389_v45  ;;  %v1390_v59 = vld [vmem:[#allocation3 + $0x40] ss:$8 sps:$4 sm:$0xff]   ;;  %v939_v62 = vld [vmem:[%s1909_s3 + $0x10] sm:$0xff] }
  0x4b   : > { %v1371_v33 = vld [vmem:[%s1712_s8 + $0x78] sm:$0xff]   ;;  %v1373_v35 = vld [vmem:[%s1712_s8 + $0x70] sm:$0xff]   ;;  %v1375_v37 = vld [vmem:[%s1712_s8 + $0x68] sm:$0xff]   ;;  %725 = vmatprep.mubr.bf16.mxu1 %v1392_v46  ;;  %837 = vperm.xlu1 %1370, %v811_v48   ;;  %vm1071_vm0 = vcmask 1040384   ;;  %vm1072_vm1 = vsmask.f32 256 }
  0x4c   : > { %v1372_v34 = vld [vmem:[%s1712_s8 + $0x38] sm:$0xff]   ;;  %1220 = vmatprep.subr.bf16.mxu0 %v1371_v33  ;;  %1284 = vmatprep.subr.bf16.mxu1 %v1371_v33  ;;  %v1374_v36 = vld [vmem:[%s1712_s8 + $0x30] sm:$0xff]   ;;  %v1376_v38 = vld [vmem:[%s1712_s8 + $0x28] sm:$0xff]   ;;  %s1217_s11 = sshll.u32 %s1509_s18, 4  ;;  %s393_s12 = scalar_lea.vmem [#allocation7], %s1709_s6 }
  0x4d   : > { %1221 = vmatpush3.bf16.msra.mxu0 %v1372_v34  ;;  %1292 = vmatpush3.bf16.msra.mxu1 %v1372_v34  ;;  %v1377_v39 = vld [vmem:[%s1712_s8 + $0x60] sm:$0xff]   ;;  %v1379_v41 = vld [vmem:[%s1712_s8 + $0x58] sm:$0xff]   ;;  %v1381_v43 = vld [vmem:[%s1712_s8 + $0x50] sm:$0xff]   ;;  %s1090_s13 = sshll.u32 %s393_s12, 4  ;;  %s1864_s22 = scalar_lea.hbm %s1910_s4, %s1217_s11  ;;  %s1091_s13 = int_to_ptr.vmem [resolvable:$true] %s1090_s13 }
  0x4e   : > { %1222 = vmatprep.subr.bf16.mxu0 %v1373_v35  ;;  %1285 = vmatprep.subr.bf16.mxu1 %v1373_v35  ;;  %v1378_v40 = vld [vmem:[%s1712_s8 + $0x20] sm:$0xff]   ;;  %v1380_v42 = vld [vmem:[%s1712_s8 + $0x18] sm:$0xff]   ;;  %v1382_v47 = vld [vmem:[%s1712_s8 + $0x10] sm:$0xff]   ;;  %s1078_s24 = scalar_lea.sflag [#allocation5], %s1709_s6  ;;  %s1437_s27 = scalar_lea.vmem %s1091_s13, 16 }
  0x4f   : > { %v810_v49 = vld [vmem:[%s1908_s2 + $0x8] sm:$0xff]  ;;  %v813_v53 = vld [vmem:[%s1908_s2 + $0x20] sm:$0xff]  ;;  %842 = vperm.xlu1 %1370, %v812_v52   ;;  %v1393_v60 = vld [vmem:[#allocation3 + $0x14] ss:$8 sps:$4 sm:$0xff]   ;;  %p1438_p4 = scmp.ne.s32.totalorder %s1091_s13, %s1437_s27  ;;  %p1917_p11 = scmp.ne.s32.totalorder %s1913_s26, 0 }
  0x50   : > { %v1383_v50 = vld [vmem:[%s1712_s8 + $0x48] sm:$0xff]   ;;  %832 = vperm.xlu0 %1369, %v810_v49   ;;  %v1385_v54 = vld [vmem:[%s1712_s8 + $0x40] sm:$0xff]   ;;  %v1395_v61 = vld [vmem:[#allocation3 + $0x54] ss:$8 sps:$4 sm:$0xff]   ;;  %s1523_s18 = smov [#allocation7]  }
  0x51   : > { %1223 = vmatpush3.bf16.msra.mxu0 %v1374_v36  ;;  %1293 = vmatpush3.bf16.msra.mxu1 %v1374_v36  ;;  %v1384_v51 = vld [vmem:[%s1712_s8 + $0x8] sm:$0xff]   ;;  %v1386_v55 = vld [vmem:[%s1712_s8] sm:$0xff]   ;;  %v940_v0 = vld [vmem:[%s1909_s3 + $0x18] sm:$0xff]  ;;  %p1439_p12 = pnand %p1438_p4, %p1917_p11  ;;  %s1441_s25 = sshll.u32 %s1523_s18, 4  ;;  %s1442_s25 = int_to_ptr.vmem [resolvable:$false] %s1441_s25 }
  0x52   : > { %1224 = vmatprep.subr.bf16.mxu0 %v1375_v37  ;;  %1286 = vmatprep.subr.bf16.mxu1 %v1375_v37  ;;  %v937_v56 = vld [vmem:[%s1909_s3] sm:$0xff]  ;;  %v938_v57 = vld [vmem:[%s1909_s3 + $0x8] sm:$0xff]  ;;  %v815_v1 = vld [vmem:[%s1908_s2 + $0x30] sm:$0xff]  ;;  %s1443_s7 = scalar_lea.vmem %s1442_s25, 32  ;;  %p1444_p0 = scmp.lt.s32.totalorder %s1091_s13, %s1442_s25 }
  0x53   : > { %955 = vperm.xlu1 %1370, %v937_v56   ;;  %v814_v63 = vld [vmem:[%s1908_s2 + $0x28] sm:$0xff]  ;;  %v1397_v2 = vld [vmem:[#allocation3 + $0x10] ss:$8 sps:$4 sm:$0xff]   ;;  %v941_v6 = vld [vmem:[%s1909_s3 + $0x20] sm:$0xff]  ;;  %p1440_p13 = pneg %p1439_p12  ;;  %p1445_p1 = scmp.lt.s32.totalorder %s1443_s7, %s1437_s27 }
  0x54   : > { %847 = vperm.xlu0 %1369, %v813_v53   ;;  %v1398_v3 = vld [vmem:[#allocation3 + $0x50] ss:$8 sps:$4 sm:$0xff]   ;;  %v1399_v4 = vld [vmem:[#allocation3 + $0x24] ss:$8 sps:$4 sm:$0xff]   ;;  %v1403_v10 = vld [vmem:[#allocation3 + $0x20] ss:$8 sps:$4 sm:$0xff]  }
  0x55   : > { %1225 = vmatpush3.bf16.msra.mxu0 %v1376_v38  ;;  %1294 = vmatpush3.bf16.msra.mxu1 %v1376_v38  ;;  %v1401_v5 = vld [vmem:[#allocation3 + $0x64] ss:$8 sps:$4 sm:$0xff]   ;;  %v816_v7 = vld [vmem:[%s1908_s2 + $0x38] sm:$0xff]  ;;  %v1404_v11 = vld [vmem:[#allocation3 + $0x60] ss:$8 sps:$4 sm:$0xff]   ;;  %p1446_p2 = por %p1445_p1, %p1444_p0 }
  0x56   : > { %1226 = vmatprep.subr.bf16.mxu0 %v1377_v39  ;;  %1287 = vmatprep.subr.bf16.mxu1 %v1377_v39  ;;  %v942_v8 = vld [vmem:[%s1909_s3 + $0x28] sm:$0xff]  ;;  %v817_v9 = vld [vmem:[%s1908_s2 + $0x40] sm:$0xff]  ;;  %v1405_v12 = vld [vmem:[#allocation3 + $0x34] ss:$8 sps:$4 sm:$0xff]  }
  0x57   : > { %965 = vperm.xlu1 %1370, %v939_v62   ;;  %v1407_v13 = vld [vmem:[#allocation3 + $0x74] ss:$8 sps:$4 sm:$0xff]   ;;  %v818_v15 = vld [vmem:[%s1908_s2 + $0x48] sm:$0xff]  ;;  %v1409_v18 = vld [vmem:[#allocation3 + $0x30] ss:$8 sps:$4 sm:$0xff]   ;;  %p1447_p3 = pnand %p1446_p2, %p1440_p13 }
  0x58   : > { %960 = vperm.xlu0 %1369, %v938_v57   ;;  %v943_v14 = vld [vmem:[%s1909_s3 + $0x30] sm:$0xff]  ;;  %v944_v16 = vld [vmem:[%s1909_s3 + $0x38] sm:$0xff]  ;;  %v945_v20 = vld [vmem:[%s1909_s3 + $0x40] sm:$0xff] }
  0x59   : > { %1227 = vmatpush3.bf16.msra.mxu0 %v1378_v40  ;;  %1295 = vmatpush3.bf16.msra.mxu1 %v1378_v40  ;;  %v819_v17 = vld [vmem:[%s1908_s2 + $0x50] sm:$0xff]  ;;  %v820_v21 = vld [vmem:[%s1908_s2 + $0x58] sm:$0xff]  ;;  %v946_v22 = vld [vmem:[%s1909_s3 + $0x48] sm:$0xff] }
  0x5a   : > { %1228 = vmatprep.subr.bf16.mxu0 %v1379_v41  ;;  %1288 = vmatprep.subr.bf16.mxu1 %v1379_v41  ;;  %v1410_v19 = vld [vmem:[#allocation3 + $0x70] ss:$8 sps:$4 sm:$0xff]   ;;  %v821_v23 = vld [vmem:[%s1908_s2 + $0x60] sm:$0xff]  ;;  %v822_v25 = vld [vmem:[%s1908_s2 + $0x68] sm:$0xff] }
  0x5b   : > { %970 = vperm.xlu1 %1370, %v940_v0   ;;  %v947_v24 = vld [vmem:[%s1909_s3 + $0x50] sm:$0xff]  ;;  %v948_v26 = vld [vmem:[%s1909_s3 + $0x58] sm:$0xff]  ;;  %v949_v28 = vld [vmem:[%s1909_s3 + $0x60] sm:$0xff] }
  0x5c   : > { %852 = vperm.xlu0 %1369, %v814_v63   ;;  %v823_v27 = vld [vmem:[%s1908_s2 + $0x70] sm:$0xff]  ;;  %v824_v29 = vld [vmem:[%s1908_s2 + $0x78] sm:$0xff]  ;;  %v950_v30 = vld [vmem:[%s1909_s3 + $0x68] sm:$0xff] }
  0x5d   : > { %1229 = vmatpush3.bf16.msra.mxu0 %v1380_v42  ;;  %1296 = vmatpush3.bf16.msra.mxu1 %v1380_v42  ;;  %v951_v31 = vld [vmem:[%s1909_s3 + $0x70] sm:$0xff]  ;;  %v952_v32 = vld [vmem:[%s1909_s3 + $0x78] sm:$0xff]  ;;  %vm1073_vm2 = vmand %vm1071_vm0, %vm1072_vm1 }
  0x5e   : > { %1230 = vmatprep.subr.bf16.mxu0 %v1381_v43  ;;  %1289 = vmatprep.subr.bf16.mxu1 %v1381_v43 }
  0x5f   : > { %975 = vperm.xlu1 %1370, %v941_v6  }
  0x60   : > { %857 = vperm.xlu0 %1369, %v815_v1  }
  0x61   : > { %1231 = vmatpush3.bf16.msra.mxu0 %v1382_v47  ;;  %1297 = vmatpush3.bf16.msra.mxu1 %v1382_v47 }
  0x62   : > { %1232 = vmatprep.subr.bf16.mxu0 %v1383_v50  ;;  %1290 = vmatprep.subr.bf16.mxu1 %v1383_v50 }
  0x63   : > { %980 = vperm.xlu1 %1370, %v942_v8  }
  0x64   : > { %862 = vperm.xlu0 %1369, %v816_v7  }
  0x65   : > { %1233 = vmatpush3.bf16.msra.mxu0 %v1384_v51  ;;  %1298 = vmatpush3.bf16.msra.mxu1 %v1384_v51 }
  0x66   : > { %1234 = vmatprep.subr.bf16.mxu0 %v1385_v54  ;;  %1291 = vmatprep.subr.bf16.mxu1 %v1385_v54 }
  0x67   : > { %985 = vperm.xlu1 %1370, %v943_v14  }
  0x68   : > { %867 = vperm.xlu0 %1369, %v817_v9  }
  0x69   : > { %1235 = vmatpush3.bf16.msra.mxu0 %v1386_v55  ;;  %1299 = vmatpush3.bf16.msra.mxu1 %v1386_v55 }
  0x6b   : > { %990 = vperm.xlu1 %1370, %v944_v16  }
  0x6c   : > { %694 = vmatmul.mubr.bf16.vlgmr.msra.gmra.mxu0 %v1387_v58  ;;  %726 = vmatmul.mubr.bf16.vlgmr.msra.gmra.mxu1 %v1390_v59 }
  0x6d   : > { %701 = vmatprep.mubr.bf16.mxu0 %v1393_v60  ;;  %733 = vmatprep.mubr.bf16.mxu1 %v1395_v61 }
  0x6e   : > { %872 = vperm.xlu0 %1369, %v818_v15  }
  0x6f   : > { %995 = vperm.xlu1 %1370, %v945_v20  }
  0x72   : > { %877 = vperm.xlu0 %1369, %v819_v17  }
  0x73   : > { %1000 = vperm.xlu1 %1370, %v946_v22  }
  0x74   : > { %702 = vmatmul.mubr.bf16.gmra.mxu0 %v1397_v2  ;;  %734 = vmatmul.mubr.bf16.gmra.mxu1 %v1398_v3 }
  0x75   : > { %709 = vmatprep.mubr.bf16.mxu0 %v1399_v4  ;;  %741 = vmatprep.mubr.bf16.mxu1 %v1401_v5 }
  0x76   : > { %882 = vperm.xlu0 %1369, %v820_v21  }
  0x77   : > { %1005 = vperm.xlu1 %1370, %v947_v24  }
  0x7a   : > { %887 = vperm.xlu0 %1369, %v821_v23  }
  0x7b   : > { %1010 = vperm.xlu1 %1370, %v948_v26  }
  0x7c   : > { %710 = vmatmul.mubr.bf16.gmra.mxu0 %v1403_v10  ;;  %742 = vmatmul.mubr.bf16.gmra.mxu1 %v1404_v11 }
  0x7d   : > { %717 = vmatprep.mubr.bf16.mxu0 %v1405_v12  ;;  %749 = vmatprep.mubr.bf16.mxu1 %v1407_v13 }
  0x7e   : > { %892 = vperm.xlu0 %1369, %v822_v25  }
  0x7f   : > { %1015 = vperm.xlu1 %1370, %v949_v28  }
  0x82   : > { %897 = vperm.xlu0 %1369, %v823_v27  }
  0x83   : > { %1020 = vperm.xlu1 %1370, %v950_v30  }
  0x84   : > { %718 = vmatmul.mubr.bf16.gmra.mxu0 %v1409_v18  ;;  %750 = vmatmul.mubr.bf16.gmra.mxu1 %v1410_v19 }
  0x86   : > { %902 = vperm.xlu0 %1369, %v824_v29  }
  0x87   : > { %1030 = vperm.xlu1 %1370, %v952_v32  }
  0x8a   : > { %1025 = vperm.xlu0 %1369, %v951_v31  }
  0xc5   : > { %v828_v33 = vpop.permute.xlu0 %827 }
  0xc6   : > { %v838_v34 = vpop.permute.xlu1 %837 }
  0xca   : > { %v843_v36 = vpop.permute.xlu1 %842 }
  0xcb   : > { %v833_v35 = vpop.permute.xlu0 %832 }
  0xce   : > { %v956_v38 = vpop.permute.xlu1 %955 }
  0xcf   : > { %v848_v37 = vpop.permute.xlu0 %847 }
  0xd2   : > { %v966_v40 = vpop.permute.xlu1 %965 }
  0xd3   : > { %v961_v39 = vpop.permute.xlu0 %960 }
  0xd6   : > { %v1826_v42 = vpop.permute.xlu1 %970 }
  0xd7   : > { %v853_v41 = vpop.permute.xlu0 %852 }
  0xda   : > { %v1830_v44 = vpop.permute.xlu1 %975 }
  0xdb   : > { %v1828_v43 = vpop.permute.xlu0 %857 }
  0xde   : > { %v1834_v46 = vpop.permute.xlu1 %980 }
  0xdf   : > { %v1832_v45 = vpop.permute.xlu0 %862 }
  0xe2   : > { %v1838_v52 = vpop.permute.xlu1 %985 }
  0xe3   : > { %v1836_v49 = vpop.permute.xlu0 %867 }
  0xe6   : > { %v1842_v60 = vpop.permute.xlu1 %990 }
  0xe9   : > { %v1840_v57 = vpop.permute.xlu0 %872 }
  0xea   : > { %v1846_v7 = vpop.permute.xlu1 %995 }
  0xed   : > { %v1844_v2 = vpop.permute.xlu0 %877 }
  0xee   : > { %v1001_v22 = vpop.permute.xlu1 %1000 }
  0xf1   : > { %v883_v16 = vpop.permute.xlu0 %882 }
  0xf5   : > { %v888_v32 = vpop.permute.xlu0 %887 }
 0x12c   : > { %v1236_v47 = vpop.f32.mrf.mxu0  ;;  %v1260_v48 = vpop.f32.mrf.mxu1 }
 0x12e   : > { %v1237_v50 = vpop.f32.mrf.mxu0  ;;  %v1261_v51 = vpop.f32.mrf.mxu1 }
 0x12f   : > { %v1238_v3 = vadd.f32 %v1237_v50, %v1236_v47  ;;  %v1262_v50 = vadd.f32 %v1261_v51, %v1260_v48 }
 0x130   : > { %v1239_v53 = vpop.f32.mrf.mxu0  ;;  %v1263_v54 = vpop.f32.mrf.mxu1 }
 0x131   : > { %v905_v12 = vadd.f32 %v1238_v3, %v828_v33 }
 0x132   : > { %v1240_v55 = vpop.f32.mrf.mxu0  ;;  %v1264_v56 = vpop.f32.mrf.mxu1 }
 0x133   : > { %v1241_v63 = vadd.f32 %v1240_v55, %v1239_v53  ;;  %v921_v23 = vmax.f32 %v905_v12, 0.0 }
 0x134   : > { %v1242_v58 = vpop.f32.mrf.mxu0  ;;  %v1266_v59 = vpop.f32.mrf.mxu1 }
 0x135   : > { %v906_v8 = vadd.f32 %v1241_v63, %v833_v35  ;;  %v1033_v33 = vmul.f32 %v956_v38, %v921_v23  ;;  %v913_v38 = vadd.f32 %v1262_v50, %v1836_v49 }
 0x136   : > { %v1243_v61 = vpop.f32.mrf.mxu0  ;;  %v1267_v62 = vpop.f32.mrf.mxu1 }
 0x137   : > { %v1244_v4 = vadd.f32 %v1243_v61, %v1242_v58  ;;  %v922_v17 = vmax.f32 %v906_v8, 0.0 }
 0x138   : > { %v1245_v0 = vpop.f32.mrf.mxu0  ;;  %v1269_v1 = vpop.f32.mrf.mxu1 }
 0x139   : > { %v907_v13 = vadd.f32 %v1244_v4, %v838_v34  ;;  %v1034_v28 = vmul.f32 %v961_v39, %v922_v17 }
 0x13a   : > { %v1246_v5 = vpop.f32.mrf.mxu0  ;;  %v1270_v6 = vpop.f32.mrf.mxu1 }
 0x13b   : > { %v1247_v9 = vadd.f32 %v1246_v5, %v1245_v0  ;;  %v923_v24 = vmax.f32 %v907_v13, 0.0  ;;  %v1049_v55 = vadd.f32 %v1034_v28, %v1033_v33  ;;  %v1265_v0 = vadd.f32 %v1264_v56, %v1263_v54 }
 0x13c   : > { %v1248_v10 = vpop.f32.mrf.mxu0  ;;  %v1272_v11 = vpop.f32.mrf.mxu1  ;;  %v1271_v54 = vadd.f32 %v1270_v6, %v1269_v1 }
 0x13d   : > { %v908_v18 = vadd.f32 %v1247_v9, %v843_v36  ;;  %v1035_v34 = vmul.f32 %v966_v40, %v923_v24  ;;  %v1268_v40 = vadd.f32 %v1267_v62, %v1266_v59  ;;  %v914_v12 = vadd.f32 %v1265_v0, %v1840_v57 }
 0x13e   : > { %v1249_v14 = vpop.f32.mrf.mxu0  ;;  %v1273_v15 = vpop.f32.mrf.mxu1 }
 0x13f   : > { %v1250_v19 = vadd.f32 %v1249_v14, %v1248_v10  ;;  %v924_v29 = vmax.f32 %v908_v18, 0.0  ;;  %v1050_v39 = vadd.f32 %v1049_v55, %v1035_v34  ;;  %v893_v10 = vpop.permute.xlu0 %892  ;;  %v929_v14 = vmax.f32 %v913_v38, 0.0 }
 0x140   : > { %v1251_v20 = vpop.f32.mrf.mxu0  ;;  %v1275_v21 = vpop.f32.mrf.mxu1  ;;  %v915_v59 = vadd.f32 %v1268_v40, %v1844_v2  ;;  %v1274_v62 = vadd.f32 %v1273_v15, %v1272_v11 }
 0x141   : > { %v909_v25 = vadd.f32 %v1250_v19, %v848_v37  ;;  %v1036_v58 = vmul.f32 %v1826_v42, %v924_v29  ;;  %v1006_v37 = vpop.permute.xlu1 %1005  ;;  %v916_v19 = vadd.f32 %v1271_v54, %v883_v16  ;;  %v1041_v6 = vmul.f32 %v1846_v7, %v929_v14 }
 0x142   : > { %v1252_v26 = vpop.f32.mrf.mxu0  ;;  %v1276_v27 = vpop.f32.mrf.mxu1  ;;  %v931_v24 = vmax.f32 %v915_v59, 0.0 }
 0x143   : > { %v1253_v30 = vadd.f32 %v1252_v26, %v1251_v20  ;;  %v925_v35 = vmax.f32 %v909_v25, 0.0  ;;  %v1051_v51 = vadd.f32 %v1050_v39, %v1036_v58  ;;  %v1277_v20 = vadd.f32 %v1276_v27, %v1275_v21  ;;  %v898_v1 = vpop.permute.xlu0 %897 }
 0x144   : > { %v1254_v31 = vpop.f32.mrf.mxu0  ;;  %v1278_v36 = vpop.f32.mrf.mxu1  ;;  %v932_v2 = vmax.f32 %v916_v19, 0.0 }
 0x145   : > { %v910_v47 = vadd.f32 %v1253_v30, %v853_v41  ;;  %v1037_v4 = vmul.f32 %v1830_v44, %v925_v35  ;;  %v918_v11 = vadd.f32 %v1277_v20, %v893_v10 }
 0x146   : > { %v1255_v53 = vpop.f32.mrf.mxu0  ;;  %v1279_v41 = vpop.f32.mrf.mxu1 }
 0x147   : > { %v926_v61 = vmax.f32 %v910_v47, 0.0  ;;  %v1256_v63 = vadd.f32 %v1255_v53, %v1254_v31  ;;  %v1052_v56 = vadd.f32 %v1051_v51, %v1037_v4  ;;  %v1280_v25 = vadd.f32 %v1279_v41, %v1278_v36  ;;  %v903_v33 = vpop.permute.xlu0 %902  ;;  %v1074_v51 = vld [vmem:[%s393_s12] sm:$0x1] }
 0x148   : > { %v1257_v3 = vpop.f32.mrf.mxu0  ;;  %v1281_v49 = vpop.f32.mrf.mxu1  ;;  %v1043_v31 = vmul.f32 %v1006_v37, %v931_v24  ;;  %v934_v34 = vmax.f32 %v918_v11, 0.0 }
 0x149   : > { %v911_v5 = vadd.f32 %v1256_v63, %v1828_v43  ;;  %v1038_v8 = vmul.f32 %v1834_v46, %v926_v61  ;;  %v1011_v43 = vpop.permute.xlu1 %1010  ;;  %v930_v46 = vmax.f32 %v914_v12, 0.0  ;;  %v919_v21 = vadd.f32 %v1280_v25, %v898_v1 }
 0x14a   : > { %v1258_v48 = vpop.f32.mrf.mxu0 }
 0x14b   : > { %v927_v9 = vmax.f32 %v911_v5, 0.0  ;;  %v1259_v42 = vadd.f32 %v1258_v48, %v1257_v3  ;;  %v1053_v17 = vadd.f32 %v1052_v56, %v1038_v8  ;;  %v1042_v29 = vmul.f32 %v1001_v22, %v930_v46  ;;  %v1026_v58 = vpop.permute.xlu0 %1025 }
 0x14d   : > { %v1039_v13 = vmul.f32 %v1838_v52, %v927_v9  ;;  %v912_v44 = vadd.f32 %v1259_v42, %v1832_v45  ;;  %v1282_v52 = vpop.f32.mrf.mxu1  ;;  %v917_v45 = vadd.f32 %v1274_v62, %v888_v32  ;;  %v1016_v28 = vpop.permute.xlu1 %1015  ;;  %v935_v32 = vmax.f32 %v919_v21, 0.0 }
 0x14e   : > { %v1283_v30 = vadd.f32 %v1282_v52, %v1281_v49 }
 0x14f   : > { %v928_v18 = vmax.f32 %v912_v44, 0.0  ;;  %v1054_v23 = vadd.f32 %v1053_v17, %v1039_v13  ;;  %v933_v16 = vmax.f32 %v917_v45, 0.0  ;;  %v1047_v61 = vmul.f32 %v1026_v58, %v935_v32 }
 0x150   : > { %v920_v7 = vadd.f32 %v1283_v30, %v903_v33 }
 0x151   : > { %v1040_v57 = vmul.f32 %v1842_v60, %v928_v18  ;;  %v1044_v60 = vmul.f32 %v1011_v43, %v932_v2  ;;  %v1021_v47 = vpop.permute.xlu1 %1020  ;;  %v1045_v50 = vmul.f32 %v1016_v28, %v933_v16 }
 0x152   : > { %v1046_v53 = vmul.f32 %v1021_v47, %v934_v34  ;;  %v936_v55 = vmax.f32 %v920_v7, 0.0 }
 0x153   : > { %v1055_v26 = vadd.f32 %v1054_v23, %v1040_v57 }
 0x155   : > { %v1056_v15 = vadd.f32 %v1055_v26, %v1041_v6  ;;  %v1031_v37 = vpop.permute.xlu1 %1030 }
 0x156   : > { %v1048_v0 = vmul.f32 %v1031_v37, %v936_v55 }
 0x157   : > { %v1057_v27 = vadd.f32 %v1056_v15, %v1042_v29 }
 0x159   : > { %v1058_v35 = vadd.f32 %v1057_v27, %v1043_v31 }
 0x15b   : > { %v1059_v36 = vadd.f32 %v1058_v35, %v1044_v60 }
 0x15d   : > { %v1060_v22 = vadd.f32 %v1059_v36, %v1045_v50 }
 0x15f   : > { %v1061_v63 = vadd.f32 %v1060_v22, %v1046_v53 }
 0x161   : > { %v1062_v3 = vadd.f32 %v1061_v63, %v1047_v61 }
 0x163   : > { %v1063_v39 = vadd.f32 %v1062_v3, %v1048_v0 }
 0x165   : > { %v1064_v4 = vrot.slane %v1063_v39, 4 }
 0x167   : > { %v1065_v5 = vadd.f32 %v1064_v4, %v1063_v39 }
 0x169   : > { %v1066_v38 = vrot.slane %v1065_v5, 2 }
 0x16b   : > { %v1067_v40 = vadd.f32 %v1066_v38, %v1065_v5 }
 0x16d   : > { %v1068_v41 = vrot.slane %v1067_v40, 1 }
 0x16f   : > { %v1069_v48 = vadd.f32 %v1068_v41, %v1067_v40 }
 0x171   : > { %v1070_v8 = vpack.c.bf16 %v1069_v48, %v1069_v48 }
 0x173   : > { %v1075_v9 = vsel %vm1073_vm2, %v1070_v8, %v1074_v51 }
 0x174   : > { %1076 = vst [vmem:[%s393_s12] sm:$0x1] %v1075_v9 }
 0x175   : > { %1450 = shalt.err (!%p1447_p3)
}
 0x176   : > { %s1451_s30 = scalar_lea.hbm %s1864_s22, 16  ;;  %s1455_s5 = scalar_lea.hbm %s1910_s4, 32 }
 0x177   : > { %p1452_p6 = scmp.ne.s32.totalorder %s1864_s22, %s1451_s30  ;;  %p1456_p9 = scmp.lt.s32.totalorder %s1864_s22, %s1910_s4 }
 0x178   : > { %p1457_p10 = scmp.lt.s32.totalorder %s1455_s5, %s1451_s30 }
 0x179   : > { %p1453_p7 = pnand %p1452_p6, %p1917_p11 }
 0x17a   : > { %p1458_p4 = por %p1457_p10, %p1456_p9 }
 0x17b   : > { %p1454_p8 = pneg %p1453_p7 }
 0x17d   : > { %p1459_p12 = pnand %p1458_p4, %p1454_p8 }
 0x17f   : > { %1462 = shalt.err (!%p1459_p12)
}
 0x180   : > { %1304 = dma.vmem_to_hbm [thread:$0]  (%p1917_p11), %s1091_s13, 16, %s1864_s22, %s1078_s24  }
 0x181 PF: > { %s1102_s11 = sand.u32 1, %s1497_s15   ;;  %p1918_p13 = scmp.ne.s32.totalorder %s1914_s29, 0 }
 0x182   : > { %s1103_s12 = scalar_lea.sflag [#allocation5], %s1102_s11 }
 0x183   : > { %p1311_p0 = pnand %p1179_p5, %p1918_p13 }
 0x185   : > { %p1312_p1 = pneg %p1311_p0 }
 0x187   : > { %1492 = dma.done.wait (%p1312_p1), %s1103_s12, 16  }
 0x188   : > { %1494 = vsyncadd (%p1312_p1), %s1103_s12, 4294967280  ;;  %s18_s20 = sadd.s32 1, %s1517_s20   ;;  %s1919_s15 = smov %s1501_s16 }
 0x189   : > { %p15_p2 = scmp.ge.s32.totalorder %s18_s20, 4   ;;  %s1920_s16 = smov %s1505_s17 }
 0x18a   : > { %s1921_s17 = smov %s1603_s28  ;;  %s1922_s18 = smov %s1513_s19 }
 0x18b   : > { %s1923_s19 = smov %s1925_s23  ;;  %17 = sbr.rel (!%p15_p2) target bundleno = 5 (0x5), region = 131 }
 0x190   :  { %1107 = vsyncpa [#allocation4], 1 }
 0x191   :  { %1109 = vsyncpa [#allocation4 + $0x1], 1 }
 0x192   :  { %1110 = vsyncpa [#allocation5], 1 }
 0x193   :  { %1112 = vsyncpa [#allocation5 + $0x1], 1 }

</bundles_post_ra>
